<compile_context>
chip_gen: v7x
topology: tpu7x:2x2x1
jax: 0.10.0
libtpu: 0.0.40
codegen_flags: <defaults>
</compile_context>

<pallas_src>
import functools

import numpy as np

import jax
import jax.numpy as jnp
from jax import lax
from jax.experimental import pallas as pl
from jax.experimental.pallas import tpu as pltpu


def _round_up(x, m):
    return ((x + m - 1) // m) * m


# ----------------------------------------------------------------------------
# Per-generation budgets
# ----------------------------------------------------------------------------
_BUDGETS = None


def _budgets():
    """VMEM / tile budgets per TPU generation (v5e & v6e: 128 MiB VMEM, v7x: 64 MiB/TC)."""
    global _BUDGETS
    if _BUDGETS is None:
        cap = 64 * 1024 * 1024
        try:
            cap = int(pltpu.get_tpu_info().vmem_capacity_bytes)
        except Exception:
            pass
        if cap >= 96 * 1024 * 1024:          # v5e / v6e (128 MiB VMEM)
            _BUDGETS = dict(vmem_limit=64 * 1024 * 1024, tm=1024,
                            level_block_bytes=4 * 1024 * 1024)
        else:                                 # v7x (64 MiB VMEM per TensorCore)
            _BUDGETS = dict(vmem_limit=40 * 1024 * 1024, tm=512,
                            level_block_bytes=2 * 1024 * 1024)
    return _BUDGETS


# ----------------------------------------------------------------------------
# 1x1 convolution (row-tiled matmul)
# ----------------------------------------------------------------------------
def _pw_conv_kernel(x_ref, w_ref, b_ref, o_ref, *, small_k):
    if small_k:
        # Tiny contraction (e.g. RGB stem, Cin=3): unrolled VPU FMAs, no MXU, no padding.
        x = x_ref[...]
        w = w_ref[...]
        acc = jnp.zeros((x.shape[0], w.shape[1]), jnp.float32) + b_ref[...]
        for k in range(x.shape[1]):
            acc = acc + x[:, k:k + 1] * w[k:k + 1, :]
        o_ref[...] = acc.astype(o_ref.dtype)
    else:
        o_ref[...] = (jnp.dot(x_ref[...], w_ref[...], preferred_element_type=jnp.float32)
                      + b_ref[...]).astype(o_ref.dtype)


def pointwise_conv(x_nhwc, w, b):
    """1x1 conv, stride 1, channels-last.  x: (N,H,W,Cin)  w: (Cin,Cout)  b: (Cout,)."""
    N, H, W, cin = x_nhwc.shape
    cout = w.shape[1]
    M = N * H * W
    bud = _budgets()

    if M <= 8:
        tm = M
    else:
        # keep >=2 grid steps so both TensorCores are used on v7x
        tm = min(bud["tm"], max(8, _round_up(pl.cdiv(M, 2), 8)))
    grid_m = pl.cdiv(M, tm)

    x2 = x_nhwc.reshape(M, cin)          # free reshape: channels already minor
    kern = functools.partial(_pw_conv_kernel, small_k=(cin < 8))

    out = pl.pallas_call(
        kern,
        out_shape=jax.ShapeDtypeStruct((M, cout), jnp.float32),
        grid=(grid_m,),
        in_specs=[
            pl.BlockSpec((tm, cin), lambda i: (i, 0)),
            pl.BlockSpec((cin, cout), lambda i: (0, 0)),
            pl.BlockSpec((1, cout), lambda i: (0, 0)),
        ],
        out_specs=pl.BlockSpec((tm, cout), lambda i: (i, 0)),
        compiler_params=pltpu.CompilerParams(
            dimension_semantics=("parallel",),
            vmem_limit_bytes=bud["vmem_limit"]),
    )(x2, w, b.reshape(1, cout))
    return out.reshape(N, H, W, cout)


# ----------------------------------------------------------------------------
# Fused decoder level:
#   out = bilinear_upsample(x, size=res.shape[1:3]) + conv1x1(res, wl, bl)
#   (optionally) pred = conv1x1(out, wp, bp)
# ----------------------------------------------------------------------------
def _fused_level_kernel(x_ref, res_ref, wl_ref, bl_ref, *rest,
                        hin, hout, win, th, cin, cdim, with_pred):
    if with_pred:
        wp_ref, bp_ref, o_ref, p_ref = rest
    else:
        (o_ref,) = rest

    h0 = pl.program_id(1) * th
    scale = float(hin) / float(hout)

    # ---- H interpolation (2-tap bilinear, align_corners=False), one output row per tap pair
    rows = []
    for t in range(th):
        h_abs = (h0 + t).astype(jnp.float32)
        src = jnp.maximum((h_abs + 0.5) * scale - 0.5, 0.0)
        i0f = jnp.floor(src)
        frac = src - i0f
        i0 = jnp.minimum(i0f.astype(jnp.int32), hin - 1)
        i1 = jnp.minimum(i0 + 1, hin - 1)
        r0 = x_ref[0, pl.ds(i0 * win, win), :]          # (win, C)
        r1 = x_ref[0, pl.ds(i1 * win, win), :]
        rows.append((1.0 - frac) * r0 + frac * r1)
    t_h = jnp.concatenate(rows, axis=0)                 # (th*win, C), rows ordered (h, wi)

    # ---- W interpolation: exact 2x 2-tap blend, done in flat (h*win + wi) row space ----
    rows_tot = th * win
    prev = jnp.concatenate([t_h[:1, :], t_h[:-1, :]], axis=0)
    nxt = jnp.concatenate([t_h[1:, :], t_h[-1:, :]], axis=0)
    wi = lax.broadcasted_iota(jnp.int32, (rows_tot, cdim), 0) % win
    prev = jnp.where(wi == 0, t_h, prev)                # clamp at each row segment start
    nxt = jnp.where(wi == win - 1, t_h, nxt)            # clamp at each row segment end
    up_even = 0.75 * t_h + 0.25 * prev                  # output columns w = 2*wi
    up_odd = 0.75 * t_h + 0.25 * nxt                    # output columns w = 2*wi + 1

    # ---- lateral 1x1 conv on res (per W parity) + residual add ----
    r = res_ref[0]                                      # (th*win, 2*cin): [even cols | odd cols]
    y_even = jnp.dot(r[:, :cin], wl_ref[...], preferred_element_type=jnp.float32) + bl_ref[...]
    y_odd = jnp.dot(r[:, cin:], wl_ref[...], preferred_element_type=jnp.float32) + bl_ref[...]
    o_even = up_even + y_even
    o_odd = up_odd + y_odd
    o_ref[0, :, :cdim] = o_even.astype(o_ref.dtype)
    o_ref[0, :, cdim:] = o_odd.astype(o_ref.dtype)

    if with_pred:
        n_cls = wp_ref.shape[1]
        p_even = jnp.dot(o_even, wp_ref[...], preferred_element_type=jnp.float32) + bp_ref[...]
        p_odd = jnp.dot(o_odd, wp_ref[...], preferred_element_type=jnp.float32) + bp_ref[...]
        p_ref[0, :, :n_cls] = p_even.astype(p_ref.dtype)
        p_ref[0, :, n_cls:] = p_odd.astype(p_ref.dtype)


def fused_upsample_lateral_add(x_nhwc, res_nhwc, wl, bl, wp=None, bp=None):
    """Fused FPN decoder level (requires Wout == 2*Win)."""
    N, Hin, Win_, C = x_nhwc.shape
    _, Hout, Wout, Cin = res_nhwc.shape
    assert Wout == 2 * Win_
    bud = _budgets()

    # H-tile: whole image when it fits the per-block budget, otherwise a divisor of Hout.
    row_bytes = Win_ * 2 * C * 4 * 3                    # out block + even/odd intermediates
    max_rows = max(8, (bud["level_block_bytes"] // max(row_bytes, 1)) // 8 * 8)
    max_rows = min(max_rows, 64)
    th = Hout
    if th > max_rows and Hout % 8 == 0:
        th = max_rows
        while Hout % th != 0:
            th -= 8
    if (N == 1 and th == Hout and Hout >= 16 and Hout % 2 == 0
            and ((Hout // 2) * Win_) % 8 == 0):
        th = Hout // 2                                   # >=2 grid steps for v7x's 2nd core
    ht = Hout // th if Hout % th == 0 else pl.cdiv(Hout, th)

    x3 = x_nhwc.reshape(N, Hin * Win_, C)                # free reshapes
    res3 = res_nhwc.reshape(N, Hout * Win_, 2 * Cin)

    in_specs = [
        pl.BlockSpec((1, Hin * Win_, C), lambda n, h: (n, 0, 0)),
        pl.BlockSpec((1, th * Win_, 2 * Cin), lambda n, h: (n, h, 0)),
        pl.BlockSpec((Cin, C), lambda n, h: (0, 0)),
        pl.BlockSpec((1, C), lambda n, h: (0, 0)),
    ]
    args = [x3, res3, wl, bl.reshape(1, C)]
    out_shapes = [jax.ShapeDtypeStruct((N, Hout * Win_, 2 * C), jnp.float32)]
    out_specs = [pl.BlockSpec((1, th * Win_, 2 * C), lambda n, h: (n, h, 0))]

    with_pred = wp is not None
    n_cls = 0
    if with_pred:
        n_cls = wp.shape[1]
        in_specs += [pl.BlockSpec((C, n_cls), lambda n, h: (0, 0)),
                     pl.BlockSpec((1, n_cls), lambda n, h: (0, 0))]
        args += [wp, bp.reshape(1, n_cls)]
        out_shapes.append(jax.ShapeDtypeStruct((N, Hout * Win_, 2 * n_cls), jnp.float32))
        out_specs.append(pl.BlockSpec((1, th * Win_, 2 * n_cls), lambda n, h: (n, h, 0)))

    kern = functools.partial(_fused_level_kernel, hin=Hin, hout=Hout, win=Win_,
                             th=th, cin=Cin, cdim=C, with_pred=with_pred)

    result = pl.pallas_call(
        kern,
        out_shape=tuple(out_shapes) if with_pred else out_shapes[0],
        grid=(N, ht),
        in_specs=in_specs,
        out_specs=tuple(out_specs) if with_pred else out_specs[0],
        compiler_params=pltpu.CompilerParams(
            dimension_semantics=("parallel", "parallel"),
            vmem_limit_bytes=bud["vmem_limit"]),
    )(*args)

    if with_pred:
        o, p = result
        return o.reshape(N, Hout, Wout, C), p.reshape(N, Hout, Wout, n_cls)
    return result.reshape(N, Hout, Wout, C)


# ----------------------------------------------------------------------------
# General bilinear matrix (reference / non-2x fallback)
# ----------------------------------------------------------------------------
def _bilinear_matrix(out_size, in_size):
    """Row-stochastic (out, in) matrix matching F.interpolate(bilinear, align_corners=False)."""
    if out_size == in_size:
        return np.eye(out_size, dtype=np.float32)
    scale = in_size / out_size
    dst = np.arange(out_size, dtype=np.float64)
    src = np.clip((dst + 0.5) * scale - 0.5, 0.0, None)
    i0 = np.clip(np.floor(src).astype(np.int64), 0, in_size - 1)
    i1 = np.clip(i0 + 1, 0, in_size - 1)
    frac = (src - i0).astype(np.float32)
    m = np.zeros((out_size, in_size), np.float32)
    rows = np.arange(out_size)
    m[rows, i0] += 1.0 - frac
    m[rows, i1] += frac
    return m


# ----------------------------------------------------------------------------
# Model
# ----------------------------------------------------------------------------
class PanopticFPNPallas:
    """PanopticFPN forward (resnet18 decoder config) built from Pallas TPU kernels."""

    def __init__(self, arch, n_cls, key):
        assert arch == "resnet18"
        self.n_cls = n_cls
        mfactor, out_dim = 1, 128
        self.out_dim = out_dim

        def conv_params(k, cin, cout):
            kw, kb = jax.random.split(k)
            scale = 1.0 / np.sqrt(float(cin))
            w = jax.random.normal(kw, (cin, cout), jnp.float32) * scale
            b = jax.random.normal(kb, (cout,), jnp.float32) * 0.01
            return w, b

        ks = jax.random.split(key, 9)
        p = {}
        # synthetic backbone projections (res2=64ch/s4, res3=128/s8, res4=256/s16, res5=512/s32)
        p["bb2_w"], p["bb2_b"] = conv_params(ks[0], 3, 64)
        p["bb3_w"], p["bb3_b"] = conv_params(ks[1], 64, 128)
        p["bb4_w"], p["bb4_b"] = conv_params(ks[2], 128, 256)
        p["bb5_w"], p["bb5_b"] = conv_params(ks[3], 256, 512)
        # FPN decoder (matches FPNDecoder('resnet18', n_cls))
        p["layer4_w"], p["layer4_b"] = conv_params(ks[4], 512 * mfactor // 8, out_dim)  # 64 -> 128
        p["layer3_w"], p["layer3_b"] = conv_params(ks[5], 512 * mfactor // 4, out_dim)  # 128 -> 128
        p["layer2_w"], p["layer2_b"] = conv_params(ks[6], 512 * mfactor // 2, out_dim)  # 256 -> 128
        p["layer1_w"], p["layer1_b"] = conv_params(ks[7], 512 * mfactor, out_dim)       # 512 -> 128
        p["pred_w"], p["pred_b"] = conv_params(ks[8], out_dim, n_cls)
        self.params = p

    @staticmethod
    def _avg_pool(x_nhwc, s):
        N, H, W, C = x_nhwc.shape
        return x_nhwc.reshape(N, H // s, s, W // s, s, C).mean(axis=(2, 4))

    def _backbone(self, x_nhwc):
        p = self.params
        res2 = pointwise_conv(self._avg_pool(x_nhwc, 4), p["bb2_w"], p["bb2_b"])   # stride 4
        res3 = pointwise_conv(self._avg_pool(res2, 2), p["bb3_w"], p["bb3_b"])     # stride 8
        res4 = pointwise_conv(self._avg_pool(res3, 2), p["bb4_w"], p["bb4_b"])     # stride 16
        res5 = pointwise_conv(self._avg_pool(res4, 2), p["bb5_w"], p["bb5_b"])     # stride 32
        return {"res2": res2, "res3": res3, "res4": res4, "res5": res5}

    def _level(self, prev, res, wl, bl, wp=None, bp=None):
        if res.shape[2] == 2 * prev.shape[2]:
            return fused_upsample_lateral_add(prev, res, wl, bl, wp, bp)
        # TODO(synk): non-2x width ratios (odd input sizes) fall back to XLA for the resize.
        N, Hin, Win_, C = prev.shape
        _, Hout, Wout, _ = res.shape
        y = pointwise_conv(res, wl, bl)
        uh = jnp.asarray(_bilinear_matrix(Hout, Hin))
        uw = jnp.asarray(_bilinear_matrix(Wout, Win_))
        up = jnp.einsum("oh,nhwc->nowc", uh, prev)
        up = jnp.einsum("vw,nhwc->nhvc", uw, up)
        out = up + y
        if wp is not None:
            return out, pointwise_conv(out, wp, bp)
        return out

    def _decoder(self, feats, get_features=False):
        p = self.params
        o1 = pointwise_conv(feats["res5"], p["layer1_w"], p["layer1_b"])
        o2 = self._level(o1, feats["res4"], p["layer2_w"], p["layer2_b"])
        o3 = self._level(o2, feats["res3"], p["layer3_w"], p["layer3_b"])
        o4, pred = self._level(o3, feats["res2"], p["layer4_w"], p["layer4_b"],
                               wp=p["pred_w"], bp=p["pred_b"])
        if get_features:
            return o4, pred
        return pred

    def __call__(self, x_nchw, encoder_features=False, decoder_features=False):
        to_nhwc = lambda t: jnp.transpose(t, (0, 2, 3, 1))
        to_nchw = lambda t: jnp.transpose(t, (0, 3, 1, 2))
        feats = self._backbone(to_nhwc(x_nchw))
        if decoder_features:
            dec, outs = self._decoder(feats, get_features=True)
        else:
            outs = self._decoder(feats)
        outs = to_nchw(outs)
        if encoder_features:
            if decoder_features:
                return to_nchw(feats["res5"]), to_nchw(dec), outs
            return to_nchw(feats["res5"]), outs
        return outs


# ----------------------------------------------------------------------------
if __name__ == "__main__":
    HIGH = lax.Precision.HIGHEST
    kx, ky, kc, kw, kb = jax.random.split(jax.random.PRNGKey(0), 5)

    # ---- 1x1 conv (exercises the Cin=3 unrolled path and the unpadded Cout=16 output) ----
    xc = jax.random.normal(kc, (2, 8, 8, 3), jnp.float32)
    wc = jax.random.normal(kw, (3, 16), jnp.float32)
    bc = jax.random.normal(kb, (16,), jnp.float32)
    got = pointwise_conv(xc, wc, bc)
    ref = jnp.einsum("nhwc,cd->nhwd", xc, wc, precision=HIGH) + bc
    assert jnp.allclose(got, ref, atol=2e-2, rtol=2e-2)

    # ---- fused decoder level: upsample(2x) + lateral conv + add + pred head ----
    xs = jax.random.normal(kx, (2, 4, 4, 128), jnp.float32)
    rs = jax.random.normal(ky, (2, 8, 8, 64), jnp.float32)
    wl = jax.random.normal(kw, (64, 128), jnp.float32) / np.sqrt(64.0)
    bl = jax.random.normal(kb, (128,), jnp.float32) * 0.01
    wp = jax.random.normal(kc, (128, 16), jnp.float32) / np.sqrt(128.0)
    bp = jax.random.normal(kx, (16,), jnp.float32) * 0.01
    got_o, got_p = fused_upsample_lateral_add(xs, rs, wl, bl, wp, bp)
    uh = jnp.asarray(_bilinear_matrix(8, 4))
    uw = jnp.asarray(_bilinear_matrix(8, 4))
    up = jnp.einsum("oh,nhwc->nowc", uh, xs, precision=HIGH)
    up = jnp.einsum("vw,nhwc->nhvc", uw, up, precision=HIGH)
    ref_o = up + jnp.einsum("nhwc,cd->nhwd", rs, wl, precision=HIGH) + bl
    ref_p = jnp.einsum("nhwc,cd->nhwd", ref_o, wp, precision=HIGH) + bp
    assert jnp.allclose(got_o, ref_o, atol=2e-2, rtol=2e-2)
    assert jnp.allclose(got_p, ref_p, atol=2e-2, rtol=2e-2)

    # ---- full forward pass ----
    x = jax.random.normal(jax.random.PRNGKey(0), (2, 3, 128, 128), jnp.float32)   # NCHW image
    model = PanopticFPNPallas(arch="resnet18", n_cls=16, key=jax.random.PRNGKey(1))

    fwd = jax.jit(model.__call__)
    out = fwd(x)
    jax.block_until_ready(out)
    assert out.shape == (2, 16, 32, 32), out.shape     # pred at res2 (stride-4) resolution
    assert out.dtype == jnp.float32

    # feature-returning paths
    res5, dec, pred = model(x, encoder_features=True, decoder_features=True)
    jax.block_until_ready(pred)
    assert res5.shape == (2, 512, 4, 4), res5.shape
    assert dec.shape == (2, 128, 32, 32), dec.shape
    assert pred.shape == (2, 16, 32, 32), pred.shape

    print("KERNEL_OK")
</pallas_src>

<mosaic_0001>
module attributes {stable_mosaic.version = 11 : i64} {
  func.func @_pw_conv_kernel(%arg0: i32, %arg1: memref<64x3xf32, #tpu.memory_space<vmem>>, %arg2: memref<3x16xf32, #tpu.memory_space<vmem>>, %arg3: memref<1x16xf32, #tpu.memory_space<vmem>>, %arg4: memref<64x16xf32, #tpu.memory_space<vmem>>) attributes {dimension_semantics = [#tpu.dimension_semantics<parallel>], iteration_bounds = array<i64: 2>, scalar_prefetch = 0 : i64, scratch_operands = 0 : i64, tpu.core_type = #tpu.core_type<tc>, window_params = [{transform_indices = @transform_0, window_bounds = array<i64: 64, 3>}, {pipeline_mode = #tpu.pipeline_mode<synchronous>, transform_indices = @transform_1, window_bounds = array<i64: 3, 16>}, {pipeline_mode = #tpu.pipeline_mode<synchronous>, transform_indices = @transform_2, window_bounds = array<i64: 1, 16>}, {transform_indices = @transform_3, window_bounds = array<i64: 64, 16>}]} {
    %c0 = arith.constant 0 : index
    %c0_0 = arith.constant 0 : index
    %0 = vector.load %arg1[%c0, %c0_0] : memref<64x3xf32, #tpu.memory_space<vmem>>, vector<64x3xf32>
    %c0_1 = arith.constant 0 : index
    %c0_2 = arith.constant 0 : index
    %1 = vector.load %arg2[%c0_1, %c0_2] : memref<3x16xf32, #tpu.memory_space<vmem>>, vector<3x16xf32>
    %cst = arith.constant 0.000000e+00 : f32
    %2 = vector.broadcast %cst : f32 to vector<64x16xf32>
    %c0_3 = arith.constant 0 : index
    %c0_4 = arith.constant 0 : index
    %3 = vector.load %arg3[%c0_3, %c0_4] : memref<1x16xf32, #tpu.memory_space<vmem>>, vector<1x16xf32>
    %4 = vector.broadcast %3 : vector<1x16xf32> to vector<64x16xf32>
    %5 = arith.addf %2, %4 : vector<64x16xf32>
    %6 = vector.extract_strided_slice %0 {offsets = [0, 0], sizes = [64, 1], strides = [1, 1]} : vector<64x3xf32> to vector<64x1xf32>
    %7 = vector.extract_strided_slice %1 {offsets = [0, 0], sizes = [1, 16], strides = [1, 1]} : vector<3x16xf32> to vector<1x16xf32>
    %8 = vector.broadcast %6 : vector<64x1xf32> to vector<64x16xf32>
    %9 = vector.broadcast %7 : vector<1x16xf32> to vector<64x16xf32>
    %10 = arith.mulf %8, %9 : vector<64x16xf32>
    %11 = arith.addf %5, %10 : vector<64x16xf32>
    %12 = vector.extract_strided_slice %0 {offsets = [0, 1], sizes = [64, 1], strides = [1, 1]} : vector<64x3xf32> to vector<64x1xf32>
    %13 = vector.extract_strided_slice %1 {offsets = [1, 0], sizes = [1, 16], strides = [1, 1]} : vector<3x16xf32> to vector<1x16xf32>
    %14 = vector.broadcast %12 : vector<64x1xf32> to vector<64x16xf32>
    %15 = vector.broadcast %13 : vector<1x16xf32> to vector<64x16xf32>
    %16 = arith.mulf %14, %15 : vector<64x16xf32>
    %17 = arith.addf %11, %16 : vector<64x16xf32>
    %18 = vector.extract_strided_slice %0 {offsets = [0, 2], sizes = [64, 1], strides = [1, 1]} : vector<64x3xf32> to vector<64x1xf32>
    %19 = vector.extract_strided_slice %1 {offsets = [2, 0], sizes = [1, 16], strides = [1, 1]} : vector<3x16xf32> to vector<1x16xf32>
    %20 = vector.broadcast %18 : vector<64x1xf32> to vector<64x16xf32>
    %21 = vector.broadcast %19 : vector<1x16xf32> to vector<64x16xf32>
    %22 = arith.mulf %20, %21 : vector<64x16xf32>
    %23 = arith.addf %17, %22 : vector<64x16xf32>
    %c0_5 = arith.constant 0 : index
    %c0_6 = arith.constant 0 : index
    %24 = vector.load %arg4[%c0_5, %c0_6] : memref<64x16xf32, #tpu.memory_space<vmem>>, vector<64x16xf32>
    tpu.vector_store %arg4[%c0_5, %c0_6], %23 {strides = array<i32>} : memref<64x16xf32, #tpu.memory_space<vmem>>, vector<64x16xf32>,
    return
  }
  func.func @transform_0(%arg0: i32) -> (i32, i32) {
    %c0_i32 = arith.constant 0 : i32
    %c0_i32_0 = arith.constant 0 : i32
    return %arg0, %c0_i32 : i32, i32
  }
  func.func @transform_1(%arg0: i32) -> (i32, i32) {
    %c0_i32 = arith.constant 0 : i32
    %c0_i32_0 = arith.constant 0 : i32
    %c0_i32_1 = arith.constant 0 : i32
    return %c0_i32, %c0_i32_0 : i32, i32
  }
  func.func @transform_2(%arg0: i32) -> (i32, i32) {
    %c0_i32 = arith.constant 0 : i32
    %c0_i32_0 = arith.constant 0 : i32
    %c0_i32_1 = arith.constant 0 : i32
    return %c0_i32, %c0_i32_0 : i32, i32
  }
  func.func @transform_3(%arg0: i32) -> (i32, i32) {
    %c0_i32 = arith.constant 0 : i32
    %c0_i32_0 = arith.constant 0 : i32
    return %arg0, %c0_i32 : i32, i32
  }
}

</mosaic_0001>

<bundles_post_ra>
// kernel: tpu_custom_call.1
= control target key start
LH: loop header
LB: loop body
LE: loop exit
PB: predicated region body
PF: predicated region fallthrough
CT: control target
= control target key end

     0   :  { %s480_s12 = smov 0   ;;  %s531_s0 = inlined_call_operand.vmem [shape: f32[128,3], index: 0, kind: input, shape index: {}]   ;;  %s532_s1 = inlined_call_operand.vmem [shape: f32[3,16], index: 1, kind: input, shape index: {}]   ;;  %s533_s2 = inlined_call_operand.vmem [shape: f32[1,16], index: 2, kind: input, shape index: {}]   ;;  %s534_s3 = inlined_call_operand.vmem [shape: f32[128,16], index: 3, kind: output, shape index: {}]  }
   0x1 LB: > { %s420_s13 = sadd.s32 4294967295, %s455_s12   ;;  %p424_p0 = scmp.ge.s32.totalorder %s455_s12, 1  ;;  %s455_s12 = sphi %s480_s12, %s13_s12  }
   0x2   : > { %p138_p1 = scmp.lt.s32.totalorder %s455_s12, 3 }
   0x4   : > { %p139_p2 = pnand %p424_p0, %p138_p1 }
   0x5   : > { %s425_s14 = sshll.u32 (!%p139_p2), %s420_s13, 3  ;;  %v457_v0 = vmov (!%p139_p2), 0   ;;  %v458_v9 = vmov (!%p139_p2), 1   ;;  %v459_v10 = vmov (!%p139_p2), 2   ;;  %v231_v19 = vlaneseq (!%p139_p2)  ;;  %v182_v27 = vld [vmem:[%s532_s1] sm:$0x7] (!%p139_p2) }
   0x6   : > { %142 = sbr.rel (%p139_p2) target bundleno = 200 (0xc8), region = 32  ;;  %444 = vset.pattern.permute.xlu1 (!%p139_p2), %v457_v0  ;;  %443 = vset.pattern.permute.xlu0 (!%p139_p2), %v457_v0  ;;  %p163_p3 = scmp.lt.s32.totalorder (!%p139_p2), %s425_s14, 15  ;;  %v429_v38 = vld [vmem:[%s533_s2] ss:$0 sm:$0xff] (!%p139_p2)  ;;  %vm355_vm0 = vcmask (!%p139_p2), 130048  }
   0x7   : > { %v232_v22 = vshrl.u32 (!%p139_p2), %v231_v19, 7 }
   0x9   : > { %v233_v25 = vsub.s32 (!%p139_p2), 0, %v232_v22  ;;  %v285_v26 = vsub.s32 (!%p139_p2), 1, %v232_v22  ;;  %v337_v32 = vsub.s32 (!%p139_p2), 2, %v232_v22 }
   0xb   : > { %v234_v30 = vrot.slane (!%p139_p2), %v182_v27, %v233_v25  ;;  %v286_v31 = vrot.slane (!%p139_p2), %v182_v27, %v285_v26  ;;  %v338_v40 = vrot.slane (!%p139_p2), %v182_v27, %v337_v32 }
   0xd   : > { %s536_s14 = smov (!%p163_p3, %s425_s14), 15 }
   0xe   : > { %s426_s15 = sshll.u32 %s536_s14, 3 }
   0xf   : > { %s166_s18 = scalar_lea.vmem %s531_s0, %s426_s15  ;;  %s509_s25 = scalar_lea.vmem %s534_s3, %s426_s15 }
  0x10   : > { %v176_v1 = vld [vmem:[%s166_s18 + $0x10] sm:$0xff]  ;;  %v174_v2 = vld [vmem:[%s166_s18] sm:$0xff]  ;;  %v177_v3 = vld [vmem:[%s166_s18 + $0x18] sm:$0xff] }
  0x11   : > { %203 = vperm.xlu1 %444, %v176_v1   ;;  %193 = vperm.xlu0 %443, %v174_v2   ;;  %v175_v4 = vld [vmem:[%s166_s18 + $0x8] sm:$0xff]  ;;  %v178_v6 = vld [vmem:[%s166_s18 + $0x20] sm:$0xff]  ;;  %v181_v7 = vld [vmem:[%s166_s18 + $0x38] sm:$0xff] }
  0x12   : > { %v179_v5 = vld [vmem:[%s166_s18 + $0x28] sm:$0xff]  ;;  %v180_v8 = vld [vmem:[%s166_s18 + $0x30] sm:$0xff] }
  0x15   : > { %208 = vperm.xlu1 %444, %v177_v3   ;;  %198 = vperm.xlu0 %443, %v175_v4  }
  0x19   : > { %218 = vperm.xlu1 %444, %v179_v5   ;;  %213 = vperm.xlu0 %443, %v178_v6  }
  0x1d   : > { %228 = vperm.xlu1 %444, %v181_v7   ;;  %223 = vperm.xlu0 %443, %v180_v8  }
  0x21   : > { %446 = vset.pattern.permute.xlu1 %v458_v9  ;;  %445 = vset.pattern.permute.xlu0 %v458_v9 }
  0x22   : > { %256 = vperm.xlu1 %446, %v175_v4   ;;  %252 = vperm.xlu0 %445, %v174_v2  }
  0x26   : > { %260 = vperm.xlu1 %446, %v176_v1   ;;  %264 = vperm.xlu0 %445, %v177_v3  }
  0x2a   : > { %268 = vperm.xlu1 %446, %v178_v6   ;;  %272 = vperm.xlu0 %445, %v179_v5  }
  0x2e   : > { %276 = vperm.xlu1 %446, %v180_v8   ;;  %280 = vperm.xlu0 %445, %v181_v7  }
  0x32   : > { %447 = vset.pattern.permute.xlu1 %v459_v10  ;;  %448 = vset.pattern.permute.xlu0 %v459_v10 }
  0x33   : > { %304 = vperm.xlu1 %447, %v174_v2   ;;  %308 = vperm.xlu0 %448, %v175_v4  }
  0x37   : > { %312 = vperm.xlu1 %447, %v176_v1   ;;  %320 = vperm.xlu0 %448, %v178_v6  }
  0x3b   : > { %316 = vperm.xlu1 %447, %v177_v3   ;;  %328 = vperm.xlu0 %448, %v180_v8  }
  0x3f   : > { %324 = vperm.xlu1 %447, %v179_v5  }
  0x43   : > { %332 = vperm.xlu1 %447, %v181_v7  }
  0x90   : > { %v204_v11 = vpop.permute.xlu1 %203  ;;  %v194_v12 = vpop.permute.xlu0 %193 }
  0x91   : > { %v235_v34 = vmul.f32 %v234_v30, %v194_v12  ;;  %v237_v41 = vmul.f32 %v234_v30, %v204_v11 }
  0x93   : > { %v243_v43 = vadd.f32 %v429_v38, %v235_v34  ;;  %v245_v53 = vadd.f32 %v429_v38, %v237_v41 }
  0x94   : > { %v209_v13 = vpop.permute.xlu1 %208  ;;  %v199_v14 = vpop.permute.xlu0 %198 }
  0x95   : > { %v236_v33 = vmul.f32 %v234_v30, %v199_v14  ;;  %v238_v54 = vmul.f32 %v234_v30, %v209_v13 }
  0x97   : > { %v244_v42 = vadd.f32 %v429_v38, %v236_v33  ;;  %v246_v3 = vadd.f32 %v429_v38, %v238_v54 }
  0x98   : > { %v219_v15 = vpop.permute.xlu1 %218  ;;  %v214_v16 = vpop.permute.xlu0 %213 }
  0x99   : > { %v239_v44 = vmul.f32 %v234_v30, %v214_v16  ;;  %v240_v4 = vmul.f32 %v234_v30, %v219_v15 }
  0x9b   : > { %v247_v55 = vadd.f32 %v429_v38, %v239_v44  ;;  %v248_v16 = vadd.f32 %v429_v38, %v240_v4 }
  0x9c   : > { %v496_v17 = vpop.permute.xlu1 %228  ;;  %v224_v18 = vpop.permute.xlu0 %223 }
  0x9d   : > { %v241_v56 = vmul.f32 %v234_v30, %v224_v18  ;;  %v242_v15 = vmul.f32 %v234_v30, %v496_v17 }
  0x9f   : > { %v249_v5 = vadd.f32 %v429_v38, %v241_v56 }
  0xa1   : > { %v257_v20 = vpop.permute.xlu1 %256  ;;  %v253_v21 = vpop.permute.xlu0 %252 }
  0xa2   : > { %v288_v37 = vmul.f32 %v286_v31, %v257_v20  ;;  %v287_v39 = vmul.f32 %v286_v31, %v253_v21 }
  0xa4   : > { %v296_v45 = vadd.f32 %v288_v37, %v244_v42  ;;  %v295_v49 = vadd.f32 %v287_v39, %v243_v43 }
  0xa5   : > { %v261_v23 = vpop.permute.xlu1 %260  ;;  %v265_v24 = vpop.permute.xlu0 %264 }
  0xa6   : > { %v289_v46 = vmul.f32 %v286_v31, %v261_v23  ;;  %v290_v60 = vmul.f32 %v286_v31, %v265_v24  ;;  %v250_v24 = vadd.f32 %v429_v38, %v242_v15 }
  0xa8   : > { %v297_v59 = vadd.f32 %v289_v46, %v245_v53  ;;  %v298_v8 = vadd.f32 %v290_v60, %v246_v3 }
  0xa9   : > { %v269_v28 = vpop.permute.xlu1 %268  ;;  %v273_v29 = vpop.permute.xlu0 %272 }
  0xaa   : > { %v291_v50 = vmul.f32 %v286_v31, %v269_v28  ;;  %v292_v11 = vmul.f32 %v286_v31, %v273_v29 }
  0xac   : > { %v299_v63 = vadd.f32 %v291_v50, %v247_v55  ;;  %v300_v21 = vadd.f32 %v292_v11, %v248_v16 }
  0xad   : > { %v277_v35 = vpop.permute.xlu1 %276  ;;  %v281_v36 = vpop.permute.xlu0 %280 }
  0xae   : > { %v293_v0 = vmul.f32 %v286_v31, %v277_v35  ;;  %v294_v22 = vmul.f32 %v286_v31, %v281_v36 }
  0xb0   : > { %v301_v12 = vadd.f32 %v293_v0, %v249_v5  ;;  %v302_v27 = vadd.f32 %v294_v22, %v250_v24 }
  0xb2   : > { %v305_v47 = vpop.permute.xlu1 %304  ;;  %v309_v48 = vpop.permute.xlu0 %308 }
  0xb3   : > { %v339_v51 = vmul.f32 %v338_v40, %v305_v47  ;;  %v340_v52 = vmul.f32 %v338_v40, %v309_v48 }
  0xb5   : > { %v347_v57 = vadd.f32 %v339_v51, %v295_v49  ;;  %v348_v58 = vadd.f32 %v340_v52, %v296_v45 }
  0xb6   : > { %v313_v61 = vpop.permute.xlu1 %312  ;;  %v321_v62 = vpop.permute.xlu0 %320 }
  0xb7   : > { %356 = vst.msk [vmem:[%s509_s25] sm:$0xff] %vm355_vm0, %v347_v57  ;;  %357 = vst.msk [vmem:[%s509_s25 + $0x8] sm:$0xff] %vm355_vm0, %v348_v58  ;;  %v341_v1 = vmul.f32 %v338_v40, %v313_v61  ;;  %v343_v2 = vmul.f32 %v338_v40, %v321_v62 }
  0xb9   : > { %v349_v6 = vadd.f32 %v341_v1, %v297_v59  ;;  %v351_v7 = vadd.f32 %v343_v2, %v299_v63 }
  0xba   : > { %v317_v9 = vpop.permute.xlu1 %316  ;;  %v329_v10 = vpop.permute.xlu0 %328 }
  0xbb   : > { %358 = vst.msk [vmem:[%s509_s25 + $0x10] sm:$0xff] %vm355_vm0, %v349_v6  ;;  %360 = vst.msk [vmem:[%s509_s25 + $0x20] sm:$0xff] %vm355_vm0, %v351_v7  ;;  %v342_v13 = vmul.f32 %v338_v40, %v317_v9  ;;  %v345_v14 = vmul.f32 %v338_v40, %v329_v10 }
  0xbd   : > { %v350_v18 = vadd.f32 %v342_v13, %v298_v8  ;;  %v353_v19 = vadd.f32 %v345_v14, %v301_v12 }
  0xbe   : > { %v325_v20 = vpop.permute.xlu1 %324 }
  0xbf   : > { %359 = vst.msk [vmem:[%s509_s25 + $0x18] sm:$0xff] %vm355_vm0, %v350_v18  ;;  %362 = vst.msk [vmem:[%s509_s25 + $0x30] sm:$0xff] %vm355_vm0, %v353_v19  ;;  %v344_v23 = vmul.f32 %v338_v40, %v325_v20 }
  0xc1   : > { %v352_v25 = vadd.f32 %v344_v23, %v300_v21 }
  0xc2   : > { %v333_v26 = vpop.permute.xlu1 %332 }
  0xc3   : > { %361 = vst.msk [vmem:[%s509_s25 + $0x28] sm:$0xff] %vm355_vm0, %v352_v25  ;;  %v346_v28 = vmul.f32 %v338_v40, %v333_v26 }
  0xc5   : > { %v354_v29 = vadd.f32 %v346_v28, %v302_v27 }
  0xc7   : > { %363 = vst.msk [vmem:[%s509_s25 + $0x38] sm:$0xff] %vm355_vm0, %v354_v29 }
  0xc8 PF: > { %s13_s12 = sadd.s32 1, %s455_s12  }
  0xc9   : > { %p10_p4 = scmp.ge.s32.totalorder %s13_s12, 4  }
  0xcb   :  { %12 = sbr.rel (!%p10_p4) target bundleno = 1 (0x1), region = 62 }

</bundles_post_ra>
